<compile_context>
chip_gen: v7x
topology: tpu7x:2x2x1
jax: 0.10.0
libtpu: 0.0.40
codegen_flags: <defaults>
</compile_context>

<pallas_src>
import functools
import math

import jax
import jax.numpy as jnp
from jax.experimental import pallas as pl
from jax.experimental.pallas import tpu as pltpu


NEG_BIAS = -1e30  # bias on padded class columns: exp() underflows to 0


def _round_up(x: int, m: int) -> int:
    return (x + m - 1) // m * m


def _vmem_capacity_bytes() -> int:
    """Physical per-core VMEM; falls back to 64 MiB (v7x, the smallest)."""
    try:
        return int(pltpu.get_tpu_info().vmem_capacity_bytes)
    except Exception:
        return 64 * 1024 * 1024


# ------------------------------- kernel -------------------------------------

def _classifier_tv_kernel(x_ref, w1_ref, b1_ref, w2_ref, b2_ref, out_ref,
                          acc_ref, *, tv_active: bool):
    """Fused Flatten->Linear->ReLU->Linear(->softmax), K-tiled over d_in."""
    k = pl.program_id(1)

    @pl.when(k == 0)
    def _():
        acc_ref[...] = jnp.zeros_like(acc_ref)

    # First matmul, this K tile: bf16 operands, f32 MXU accumulation.
    acc_ref[...] += jnp.dot(x_ref[...], w1_ref[...],
                            preferred_element_type=jnp.float32)

    @pl.when(k == pl.num_programs(1) - 1)
    def _():
        # Hidden bias + ReLU in f32 (ReLUTV forward == ReLU).
        h = jnp.maximum(acc_ref[...] + b1_ref[...], 0.0)
        # Output layer: bf16 x bf16 on the MXU, f32 accumulation.  b2 must
        # stay f32: the padded class columns carry a -1e30 bias.
        logits = jnp.dot(h.astype(jnp.bfloat16), w2_ref[...],
                         preferred_element_type=jnp.float32) + b2_ref[...]
        if tv_active:
            # SoftMaxTV forward == numerically-stable softmax over classes.
            m = jnp.max(logits, axis=-1, keepdims=True)
            e = jnp.exp(logits - m)
            denom = jnp.sum(e, axis=-1, keepdims=True)
            out_ref[...] = e / denom        # exact normalizer (sum == 1)
        else:
            out_ref[...] = logits


# ------------------------------ wrapper --------------------------------------

def prepare_classifier_tv_params(params):
    """One-time pad + cast of the classifier weights (hoisted out of forward)."""
    w1, b1, w2, b2 = params                       # (D,H), (1,H), (H,C), (1,C)
    D, H = w1.shape
    C = w2.shape[1]

    vmem_cap = _vmem_capacity_bytes()
    big_vmem = vmem_cap >= 96 * 1024 * 1024       # v5e / v6e: 128 MiB per TC
    tk_cap = 1024 if big_vmem else 512
    tb_big = 512 if big_vmem else 256

    H_pad = _round_up(H, 128)                     # lane-dense hidden dim
    N_pad = _round_up(C, 128)                     # lane-dense class dim
    D128 = _round_up(D, 128)
    n_k = max(1, math.ceil(D128 / tk_cap))
    TK = _round_up(math.ceil(D128 / n_k), 128)    # minimizes zero-padded K
    D_pad = TK * n_k

    # bf16 weights for both matmuls (zero-padded), f32 biases.
    w1p = jnp.pad(w1.astype(jnp.bfloat16), ((0, D_pad - D), (0, H_pad - H)))
    b1p = jnp.pad(b1.astype(jnp.float32), ((0, 0), (0, H_pad - H)))
    w2p = jnp.pad(w2.astype(jnp.bfloat16), ((0, H_pad - H), (0, N_pad - C)))
    b2p = jnp.pad(b2.astype(jnp.float32), ((0, 0), (0, N_pad - C)),
                  constant_values=NEG_BIAS)

    # TODO(synk): for very large class counts, add an N grid axis (tile w2 /
    # output over classes with an online-softmax epilogue) instead of pinning
    # the full (H_pad, N_pad) w2 block in VMEM.
    return dict(w1p=w1p, b1p=b1p, w2p=w2p, b2p=b2p,
                D=D, H=H, C=C, TK=TK, D_pad=D_pad, H_pad=H_pad, N_pad=N_pad,
                tb_big=tb_big, vmem_cap=vmem_cap)


def classifier_tv_forward(x_nchw, prepared, *, tv_active: bool):
    """x_nchw: (B, C, H, W).  Returns (B, num_classes) float32."""
    w1p, b1p, w2p, b2p = (prepared[k] for k in ("w1p", "b1p", "w2p", "b2p"))
    D, C = prepared["D"], prepared["C"]
    TK, D_pad = prepared["TK"], prepared["D_pad"]
    H_pad, N_pad = prepared["H_pad"], prepared["N_pad"]
    tb_big, vmem_cap = prepared["tb_big"], prepared["vmem_cap"]

    B = x_nchw.shape[0]
    # bf16 native tile is (16, 128): round small batches to 16 sublanes.
    TB = tb_big if B >= tb_big else _round_up(B, 16)
    B_pad = _round_up(B, TB)

    # Activation prep: cast only if needed; pad only if needed (NCHW flatten).
    x2d = x_nchw.reshape(B, -1)
    if x2d.dtype != jnp.bfloat16:
        x2d = x2d.astype(jnp.bfloat16)
    if B_pad != B or D_pad != D:
        x2d = jnp.pad(x2d, ((0, B_pad - B), (0, D_pad - D)))

    # ---- VMEM budget (pinned operands single-buffered) ---------------------
    vmem_bytes = (
        2 * TB * TK * 2            # x tile (bf16), double-buffered
        + 2 * TK * H_pad * 2       # w1 tile (bf16), double-buffered
        + H_pad * 4                # b1 (f32, pinned)
        + H_pad * N_pad * 2        # w2 (bf16, pinned)
        + N_pad * 4                # b2 (f32, pinned)
        + 2 * TB * N_pad * 4       # out tile (f32), double-buffered
        + TB * H_pad * 4           # f32 accumulator scratch
    )
    headroom = 8 * 1024 * 1024
    vmem_limit = min(max(2 * vmem_bytes, 16 * 1024 * 1024),
                     vmem_cap - headroom)
    vmem_limit = int(max(vmem_limit, vmem_bytes + (1 << 20)))

    grid = (B_pad // TB, D_pad // TK)
    kernel = functools.partial(_classifier_tv_kernel, tv_active=tv_active)

    flops = 2 * B_pad * D_pad * H_pad + 2 * B_pad * H_pad * N_pad
    bytes_accessed = (B_pad * D_pad * 2
                      + (B_pad // TB) * D_pad * H_pad * 2   # w1 re-streamed per batch tile
                      + H_pad * N_pad * 2 + H_pad * 4 + N_pad * 4
                      + B_pad * N_pad * 4)
    transcendentals = B_pad * N_pad if tv_active else 0

    # TODO(synk): for grid=(1, K) on v7x (2 TensorCores), split the hidden dim
    # across a second parallel axis so both cores do work at small batch.

    def _run(pinned_mode):
        pin_kw = {} if pinned_mode is None else {"pipeline_mode": pinned_mode}
        in_specs = [
            pl.BlockSpec((TB, TK), lambda i, k: (i, k)),               # x
            pl.BlockSpec((TK, H_pad), lambda i, k: (k, 0)),            # w1
            pl.BlockSpec((1, H_pad), lambda i, k: (0, 0), **pin_kw),   # b1
            pl.BlockSpec((H_pad, N_pad), lambda i, k: (0, 0), **pin_kw),  # w2
            pl.BlockSpec((1, N_pad), lambda i, k: (0, 0), **pin_kw),   # b2
        ]
        return pl.pallas_call(
            kernel,
            out_shape=jax.ShapeDtypeStruct((B_pad, N_pad), jnp.float32),
            grid_spec=pltpu.PrefetchScalarGridSpec(
                num_scalar_prefetch=0,
                grid=grid,
                in_specs=in_specs,
                out_specs=pl.BlockSpec((TB, N_pad), lambda i, k: (i, 0)),
                scratch_shapes=[pltpu.VMEM((TB, H_pad), jnp.float32)],
            ),
            compiler_params=pltpu.CompilerParams(
                dimension_semantics=("parallel", "arbitrary"),
                vmem_limit_bytes=vmem_limit,
            ),
            cost_estimate=pl.CostEstimate(
                flops=flops,
                transcendentals=transcendentals,
                bytes_accessed=bytes_accessed),
        )(x2d, w1p, b1p, w2p, b2p)

    try:
        out = _run(pl.Buffered(1))     # single-buffer the pinned operands
    except Exception:
        # Fallback if this jax/Mosaic version rejects Buffered(1) pinning.
        out = _run(None)

    return out[:B, :C]


# ------------------------------ utilities ------------------------------------

def init_params(key, d_in, hidden, num_classes):
    k1, k2, k3, k4 = jax.random.split(key, 4)
    w1 = jax.random.normal(k1, (d_in, hidden), jnp.float32) * 0.02
    b1 = jax.random.normal(k2, (1, hidden), jnp.float32) * 0.01
    w2 = jax.random.normal(k3, (hidden, num_classes), jnp.float32) * 0.02
    b2 = jax.random.normal(k4, (1, num_classes), jnp.float32) * 0.01
    return w1, b1, w2, b2


def _reference_forward(x_nchw, params, *, tv_active: bool):
    """Pure-JAX f32 reference for correctness checking."""
    w1, b1, w2, b2 = params
    x2d = x_nchw.reshape(x_nchw.shape[0], -1)
    h = jnp.maximum(x2d @ w1 + b1, 0.0)
    logits = h @ w2 + b2
    if tv_active:
        return jax.nn.softmax(logits, axis=-1)
    return logits


if __name__ == "__main__":
    # Small shapes: batch=8, channels=4, spatial=16x16 -> d_in=1024,
    # hidden=128, num_classes=16.
    B, C, H, W = 8, 4, 16, 16
    HIDDEN, NUM_CLASSES = 128, 16
    D_IN = C * H * W

    key = jax.random.PRNGKey(0)
    kx, kp = jax.random.split(key)
    x = jax.random.normal(kx, (B, C, H, W), jnp.float32)   # layout: NCHW
    params = init_params(kp, D_IN, HIDDEN, NUM_CLASSES)

    # TODO(synk): the PyTorch module mutates self.relu/self.softmax with a
    # runtime W attribute; ReLUTV/SoftMaxTV forwards equal ReLU/softmax, so
    # TV_active is modeled here as a static flag selecting the softmax path.

    prepared = prepare_classifier_tv_params(params)   # one-time pad/cast

    # TV inactive: raw logits.  TV active: softmax over logits.
    logits = classifier_tv_forward(x, prepared, tv_active=False)
    probs = classifier_tv_forward(x, prepared, tv_active=True)
    jax.block_until_ready((logits, probs))

    assert logits.shape == (B, NUM_CLASSES)
    assert probs.shape == (B, NUM_CLASSES)

    # Correctness vs. pure-JAX f32 reference (loose tol: bf16 matmul inputs).
    ref_logits = _reference_forward(x, params, tv_active=False)
    ref_probs = _reference_forward(x, params, tv_active=True)
    assert jnp.allclose(logits, ref_logits, atol=2e-2, rtol=2e-2)
    assert jnp.allclose(probs, ref_probs, atol=2e-2, rtol=2e-2)
    assert jnp.allclose(jnp.sum(probs, axis=-1), 1.0, atol=1e-4)

    print("KERNEL_OK")
</pallas_src>

<mosaic_0001>
module attributes {stable_mosaic.version = 11 : i64} {
  func.func @_classifier_tv_kernel(%arg0: i32, %arg1: i32, %arg2: memref<16x512xbf16, #tpu.memory_space<vmem>>, %arg3: memref<512x128xbf16, #tpu.memory_space<vmem>>, %arg4: memref<1x128xf32, #tpu.memory_space<vmem>>, %arg5: memref<128x128xbf16, #tpu.memory_space<vmem>>, %arg6: memref<1x128xf32, #tpu.memory_space<vmem>>, %arg7: memref<16x128xf32, #tpu.memory_space<vmem>>, %arg8: memref<16x128xf32, #tpu.memory_space<vmem>>) attributes {dimension_semantics = [#tpu.dimension_semantics<parallel>, #tpu.dimension_semantics<arbitrary>], iteration_bounds = array<i64: 1, 2>, scalar_prefetch = 0 : i64, scratch_operands = 1 : i64, tpu.core_type = #tpu.core_type<tc>, window_params = [{transform_indices = @transform_0, window_bounds = array<i64: 16, 512>}, {transform_indices = @transform_1, window_bounds = array<i64: 512, 128>}, {pipeline_mode = #tpu.pipeline_mode<synchronous>, transform_indices = @transform_2, window_bounds = array<i64: 1, 128>}, {pipeline_mode = #tpu.pipeline_mode<synchronous>, transform_indices = @transform_3, window_bounds = array<i64: 128, 128>}, {pipeline_mode = #tpu.pipeline_mode<synchronous>, transform_indices = @transform_4, window_bounds = array<i64: 1, 128>}, {transform_indices = @transform_5, window_bounds = array<i64: 16, 128>}]} {
    %c0_i32 = arith.constant 0 : i32
    %0 = arith.cmpi eq, %arg1, %c0_i32 : i32
    %1 = arith.extui %0 : i1 to i32
    %c0_i32_0 = arith.constant 0 : i32
    %2 = arith.cmpi ne, %1, %c0_i32_0 : i32
    scf.if %2 {
      %cst_9 = arith.constant 0.000000e+00 : f32
      %12 = vector.broadcast %cst_9 : f32 to vector<16x128xf32>
      %c0_10 = arith.constant 0 : index
      %c0_11 = arith.constant 0 : index
      %13 = vector.load %arg8[%c0_10, %c0_11] : memref<16x128xf32, #tpu.memory_space<vmem>>, vector<16x128xf32>
      tpu.vector_store %arg8[%c0_10, %c0_11], %12 {strides = array<i32>} : memref<16x128xf32, #tpu.memory_space<vmem>>, vector<16x128xf32>,
    } else {
    }
    %c0 = arith.constant 0 : index
    %c0_1 = arith.constant 0 : index
    %3 = vector.load %arg8[%c0, %c0_1] : memref<16x128xf32, #tpu.memory_space<vmem>>, vector<16x128xf32>
    %c0_2 = arith.constant 0 : index
    %c0_3 = arith.constant 0 : index
    %4 = vector.load %arg2[%c0_2, %c0_3] : memref<16x512xbf16, #tpu.memory_space<vmem>>, vector<16x512xbf16>
    %c0_4 = arith.constant 0 : index
    %c0_5 = arith.constant 0 : index
    %5 = vector.load %arg3[%c0_4, %c0_5] : memref<512x128xbf16, #tpu.memory_space<vmem>>, vector<512x128xbf16>
    %cst = arith.constant dense<0.000000e+00> : vector<16x128xf32>
    %6 = tpu.matmul %4, %5, %cst {dimension_numbers = #tpu.dot_dimension_numbers<[1], [0], [0], [1], [0, 0, 1, 1], [], []>} : vector<16x512xbf16>, vector<512x128xbf16>, vector<16x128xf32> -> vector<16x128xf32>
    %7 = arith.addf %3, %6 : vector<16x128xf32>
    %c0_6 = arith.constant 0 : index
    %c0_7 = arith.constant 0 : index
    %8 = vector.load %arg8[%c0_6, %c0_7] : memref<16x128xf32, #tpu.memory_space<vmem>>, vector<16x128xf32>
    tpu.vector_store %arg8[%c0_6, %c0_7], %7 {strides = array<i32>} : memref<16x128xf32, #tpu.memory_space<vmem>>, vector<16x128xf32>,
    %c1_i32 = arith.constant 1 : i32
    %9 = arith.cmpi eq, %arg1, %c1_i32 : i32
    %10 = arith.extui %9 : i1 to i32
    %c0_i32_8 = arith.constant 0 : i32
    %11 = arith.cmpi ne, %10, %c0_i32_8 : i32
    scf.if %11 {
      %c0_9 = arith.constant 0 : index
      %c0_10 = arith.constant 0 : index
      %12 = vector.load %arg8[%c0_9, %c0_10] : memref<16x128xf32, #tpu.memory_space<vmem>>, vector<16x128xf32>
      %c0_11 = arith.constant 0 : index
      %c0_12 = arith.constant 0 : index
      %13 = vector.load %arg4[%c0_11, %c0_12] : memref<1x128xf32, #tpu.memory_space<vmem>>, vector<1x128xf32>
      %14 = vector.broadcast %13 : vector<1x128xf32> to vector<16x128xf32>
      %15 = arith.addf %12, %14 : vector<16x128xf32>
      %cst_13 = arith.constant 0.000000e+00 : f32
      %16 = vector.broadcast %cst_13 : f32 to vector<16x128xf32>
      %17 = arith.maximumf %15, %16 : vector<16x128xf32>
      %18 = arith.truncf %17 : vector<16x128xf32> to vector<16x128xbf16>
      %c0_14 = arith.constant 0 : index
      %c0_15 = arith.constant 0 : index
      %19 = vector.load %arg5[%c0_14, %c0_15] : memref<128x128xbf16, #tpu.memory_space<vmem>>, vector<128x128xbf16>
      %cst_16 = arith.constant dense<0.000000e+00> : vector<16x128xf32>
      %20 = tpu.matmul %18, %19, %cst_16 {dimension_numbers = #tpu.dot_dimension_numbers<[1], [0], [0], [1], [0, 0, 1, 1], [], []>} : vector<16x128xbf16>, vector<128x128xbf16>, vector<16x128xf32> -> vector<16x128xf32>
      %c0_17 = arith.constant 0 : index
      %c0_18 = arith.constant 0 : index
      %21 = vector.load %arg6[%c0_17, %c0_18] : memref<1x128xf32, #tpu.memory_space<vmem>>, vector<1x128xf32>
      %22 = vector.broadcast %21 : vector<1x128xf32> to vector<16x128xf32>
      %23 = arith.addf %20, %22 : vector<16x128xf32>
      %c0_19 = arith.constant 0 : index
      %c0_20 = arith.constant 0 : index
      %24 = vector.load %arg7[%c0_19, %c0_20] : memref<16x128xf32, #tpu.memory_space<vmem>>, vector<16x128xf32>
      tpu.vector_store %arg7[%c0_19, %c0_20], %23 {strides = array<i32>} : memref<16x128xf32, #tpu.memory_space<vmem>>, vector<16x128xf32>,
    } else {
    }
    return
  }
  func.func @transform_0(%arg0: i32, %arg1: i32) -> (i32, i32) {
    %c0_i32 = arith.constant 0 : i32
    return %arg0, %arg1 : i32, i32
  }
  func.func @transform_1(%arg0: i32, %arg1: i32) -> (i32, i32) {
    %c0_i32 = arith.constant 0 : i32
    %c0_i32_0 = arith.constant 0 : i32
    return %arg1, %c0_i32 : i32, i32
  }
  func.func @transform_2(%arg0: i32, %arg1: i32) -> (i32, i32) {
    %c0_i32 = arith.constant 0 : i32
    %c0_i32_0 = arith.constant 0 : i32
    %c0_i32_1 = arith.constant 0 : i32
    return %c0_i32, %c0_i32_0 : i32, i32
  }
  func.func @transform_3(%arg0: i32, %arg1: i32) -> (i32, i32) {
    %c0_i32 = arith.constant 0 : i32
    %c0_i32_0 = arith.constant 0 : i32
    %c0_i32_1 = arith.constant 0 : i32
    return %c0_i32, %c0_i32_0 : i32, i32
  }
  func.func @transform_4(%arg0: i32, %arg1: i32) -> (i32, i32) {
    %c0_i32 = arith.constant 0 : i32
    %c0_i32_0 = arith.constant 0 : i32
    %c0_i32_1 = arith.constant 0 : i32
    return %c0_i32, %c0_i32_0 : i32, i32
  }
  func.func @transform_5(%arg0: i32, %arg1: i32) -> (i32, i32) {
    %c0_i32 = arith.constant 0 : i32
    %c0_i32_0 = arith.constant 0 : i32
    return %arg0, %c0_i32 : i32, i32
  }
}

module attributes {stable_mosaic.version = 11 : i64} {
  func.func @_classifier_tv_kernel(%arg0: i32, %arg1: i32, %arg2: memref<16x512xbf16, #tpu.memory_space<vmem>>, %arg3: memref<512x128xbf16, #tpu.memory_space<vmem>>, %arg4: memref<1x128xf32, #tpu.memory_space<vmem>>, %arg5: memref<128x128xbf16, #tpu.memory_space<vmem>>, %arg6: memref<1x128xf32, #tpu.memory_space<vmem>>, %arg7: memref<16x128xf32, #tpu.memory_space<vmem>>, %arg8: memref<16x128xf32, #tpu.memory_space<vmem>>) attributes {dimension_semantics = [#tpu.dimension_semantics<parallel>, #tpu.dimension_semantics<arbitrary>], iteration_bounds = array<i64: 1, 2>, scalar_prefetch = 0 : i64, scratch_operands = 1 : i64, tpu.core_type = #tpu.core_type<tc>, window_params = [{transform_indices = @transform_0, window_bounds = array<i64: 16, 512>}, {transform_indices = @transform_1, window_bounds = array<i64: 512, 128>}, {pipeline_mode = #tpu.pipeline_mode<synchronous>, transform_indices = @transform_2, window_bounds = array<i64: 1, 128>}, {pipeline_mode = #tpu.pipeline_mode<synchronous>, transform_indices = @transform_3, window_bounds = array<i64: 128, 128>}, {pipeline_mode = #tpu.pipeline_mode<synchronous>, transform_indices = @transform_4, window_bounds = array<i64: 1, 128>}, {transform_indices = @transform_5, window_bounds = array<i64: 16, 128>}]} {
    %c0_i32 = arith.constant 0 : i32
    %0 = arith.cmpi eq, %arg1, %c0_i32 : i32
    %1 = arith.extui %0 : i1 to i32
    %c0_i32_0 = arith.constant 0 : i32
    %2 = arith.cmpi ne, %1, %c0_i32_0 : i32
    scf.if %2 {
      %cst_9 = arith.constant 0.000000e+00 : f32
      %12 = vector.broadcast %cst_9 : f32 to vector<16x128xf32>
      %c0_10 = arith.constant 0 : index
      %c0_11 = arith.constant 0 : index
      %13 = vector.load %arg8[%c0_10, %c0_11] : memref<16x128xf32, #tpu.memory_space<vmem>>, vector<16x128xf32>
      tpu.vector_store %arg8[%c0_10, %c0_11], %12 {strides = array<i32>} : memref<16x128xf32, #tpu.memory_space<vmem>>, vector<16x128xf32>,
    } else {
    }
    %c0 = arith.constant 0 : index
    %c0_1 = arith.constant 0 : index
    %3 = vector.load %arg8[%c0, %c0_1] : memref<16x128xf32, #tpu.memory_space<vmem>>, vector<16x128xf32>
    %c0_2 = arith.constant 0 : index
    %c0_3 = arith.constant 0 : index
    %4 = vector.load %arg2[%c0_2, %c0_3] : memref<16x512xbf16, #tpu.memory_space<vmem>>, vector<16x512xbf16>
    %c0_4 = arith.constant 0 : index
    %c0_5 = arith.constant 0 : index
    %5 = vector.load %arg3[%c0_4, %c0_5] : memref<512x128xbf16, #tpu.memory_space<vmem>>, vector<512x128xbf16>
    %cst = arith.constant dense<0.000000e+00> : vector<16x128xf32>
    %6 = tpu.matmul %4, %5, %cst {dimension_numbers = #tpu.dot_dimension_numbers<[1], [0], [0], [1], [0, 0, 1, 1], [], []>} : vector<16x512xbf16>, vector<512x128xbf16>, vector<16x128xf32> -> vector<16x128xf32>
    %7 = arith.addf %3, %6 : vector<16x128xf32>
    %c0_6 = arith.constant 0 : index
    %c0_7 = arith.constant 0 : index
    %8 = vector.load %arg8[%c0_6, %c0_7] : memref<16x128xf32, #tpu.memory_space<vmem>>, vector<16x128xf32>
    tpu.vector_store %arg8[%c0_6, %c0_7], %7 {strides = array<i32>} : memref<16x128xf32, #tpu.memory_space<vmem>>, vector<16x128xf32>,
    %c1_i32 = arith.constant 1 : i32
    %9 = arith.cmpi eq, %arg1, %c1_i32 : i32
    %10 = arith.extui %9 : i1 to i32
    %c0_i32_8 = arith.constant 0 : i32
    %11 = arith.cmpi ne, %10, %c0_i32_8 : i32
    scf.if %11 {
      %c0_9 = arith.constant 0 : index
      %c0_10 = arith.constant 0 : index
      %12 = vector.load %arg8[%c0_9, %c0_10] : memref<16x128xf32, #tpu.memory_space<vmem>>, vector<16x128xf32>
      %c0_11 = arith.constant 0 : index
      %c0_12 = arith.constant 0 : index
      %13 = vector.load %arg4[%c0_11, %c0_12] : memref<1x128xf32, #tpu.memory_space<vmem>>, vector<1x128xf32>
      %14 = vector.broadcast %13 : vector<1x128xf32> to vector<16x128xf32>
      %15 = arith.addf %12, %14 : vector<16x128xf32>
      %cst_13 = arith.constant 0.000000e+00 : f32
      %16 = vector.broadcast %cst_13 : f32 to vector<16x128xf32>
      %17 = arith.maximumf %15, %16 : vector<16x128xf32>
      %18 = arith.truncf %17 : vector<16x128xf32> to vector<16x128xbf16>
      %c0_14 = arith.constant 0 : index
      %c0_15 = arith.constant 0 : index
      %19 = vector.load %arg5[%c0_14, %c0_15] : memref<128x128xbf16, #tpu.memory_space<vmem>>, vector<128x128xbf16>
      %cst_16 = arith.constant dense<0.000000e+00> : vector<16x128xf32>
      %20 = tpu.matmul %18, %19, %cst_16 {dimension_numbers = #tpu.dot_dimension_numbers<[1], [0], [0], [1], [0, 0, 1, 1], [], []>} : vector<16x128xbf16>, vector<128x128xbf16>, vector<16x128xf32> -> vector<16x128xf32>
      %c0_17 = arith.constant 0 : index
      %c0_18 = arith.constant 0 : index
      %21 = vector.load %arg6[%c0_17, %c0_18] : memref<1x128xf32, #tpu.memory_space<vmem>>, vector<1x128xf32>
      %22 = vector.broadcast %21 : vector<1x128xf32> to vector<16x128xf32>
      %23 = arith.addf %20, %22 : vector<16x128xf32>
      %c0_19 = arith.constant 0 : index
      %c0_20 = arith.constant 0 : index
      %24 = vector.load %arg7[%c0_19, %c0_20] : memref<16x128xf32, #tpu.memory_space<vmem>>, vector<16x128xf32>
      tpu.vector_store %arg7[%c0_19, %c0_20], %23 {strides = array<i32>} : memref<16x128xf32, #tpu.memory_space<vmem>>, vector<16x128xf32>,
    } else {
    }
    return
  }
  func.func @transform_0(%arg0: i32, %arg1: i32) -> (i32, i32) {
    %c0_i32 = arith.constant 0 : i32
    return %arg0, %arg1 : i32, i32
  }
  func.func @transform_1(%arg0: i32, %arg1: i32) -> (i32, i32) {
    %c0_i32 = arith.constant 0 : i32
    %c0_i32_0 = arith.constant 0 : i32
    return %arg1, %c0_i32 : i32, i32
  }
  func.func @transform_2(%arg0: i32, %arg1: i32) -> (i32, i32) {
    %c0_i32 = arith.constant 0 : i32
    %c0_i32_0 = arith.constant 0 : i32
    %c0_i32_1 = arith.constant 0 : i32
    return %c0_i32, %c0_i32_0 : i32, i32
  }
  func.func @transform_3(%arg0: i32, %arg1: i32) -> (i32, i32) {
    %c0_i32 = arith.constant 0 : i32
    %c0_i32_0 = arith.constant 0 : i32
    %c0_i32_1 = arith.constant 0 : i32
    return %c0_i32, %c0_i32_0 : i32, i32
  }
  func.func @transform_4(%arg0: i32, %arg1: i32) -> (i32, i32) {
    %c0_i32 = arith.constant 0 : i32
    %c0_i32_0 = arith.constant 0 : i32
    %c0_i32_1 = arith.constant 0 : i32
    return %c0_i32, %c0_i32_0 : i32, i32
  }
  func.func @transform_5(%arg0: i32, %arg1: i32) -> (i32, i32) {
    %c0_i32 = arith.constant 0 : i32
    %c0_i32_0 = arith.constant 0 : i32
    return %arg0, %c0_i32 : i32, i32
  }
}

</mosaic_0001>

<bundles_post_ra>
// kernel: tpu_custom_call.1
= control target key start
LH: loop header
LB: loop body
LE: loop exit
PB: predicated region body
PF: predicated region fallthrough
CT: control target
= control target key end

     0   :  { %s1700_s0 = inlined_call_operand.hbm [shape: bf16[16,1024], index: 0, kind: input, shape index: {}]   ;;  %s1701_s1 = inlined_call_operand.hbm [shape: bf16[1024,128], index: 1, kind: input, shape index: {}]   ;;  %s1702_s2 = inlined_call_operand.vmem [shape: f32[1,128], index: 2, kind: input, shape index: {}]   ;;  %s1703_s3 = inlined_call_operand.hbm [shape: bf16[128,128], index: 3, kind: input, shape index: {}]   ;;  %s1704_s4 = inlined_call_operand.vmem [shape: f32[1,128], index: 4, kind: input, shape index: {}]   ;;  %s1705_s5 = inlined_call_operand.hbm [shape: f32[16,128], index: 5, kind: output, shape index: {}]  }
   0x1   :  { %1713 = sst [smem:[#allocation15_spill]] %s1700_s0 }
   0x2   :  { %1714 = sst [smem:[#allocation16_spill]] %s1703_s3 }
   0x3   :  { %10 = vsyncpa [#allocation4], 0 }
   0x4   :  { %12 = vsyncpa [#allocation4 + $0x1], 0 }
   0x5   :  { %13 = vsyncpa [#allocation7], 0 }
   0x6   :  { %15 = vsyncpa [#allocation7 + $0x1], 0 }
   0x7   :  { %16 = vsyncpa [#allocation5], 0  ;;  %s1423_s18 = smov 0   ;;  %s1425_s19 = smov 0  }
   0x8   :  { %s1427_s20 = smov 0   ;;  %s1429_s21 = smov 0  }
   0x9   :  { %s1431_s22 = smov 0   ;;  %s1433_s23 = smov 0  }
   0xa LB: > { %s1452_s24 = sadd.s32 4294967295, %s1377_s23   ;;  %s43_s25 = sadd.s32 1, %s1365_s20  ;;  %s1377_s23 = sphi %s1433_s23, %s22_s23   ;;  %s1373_s22 = sphi %s1431_s22, %s1735_s22   ;;  %s1369_s21 = sphi %s1429_s21, %s1734_s21   ;;  %s1365_s20 = sphi %s1427_s20, %s1733_s20   ;;  %s1361_s19 = sphi %s1425_s19, %s1732_s19   ;;  %s1357_s18 = sphi %s1423_s18, %s1731_s18  }
   0xb   : > { %p50_p0 = scmp.ne.s32.totalorder %s1365_s20, %s1361_s19  ;;  %p51_p1 = scmp.eq.s32.totalorder %s1377_s23, 0 }
   0xc   : > { %p56_p2 = scmp.ne.s32.totalorder %s1361_s19, %s1357_s18  ;;  %p1706_p3 = scmp.eq.s32.totalorder %s1452_s24, 0 }
   0xd   : > { %p52_p4 = por %p51_p1, %p50_p0  ;;  %p927_p5 = scmp.ge.s32.totalorder %s1377_s23, 1 }
   0xe   : > { %p1463_p6 = por %p1706_p3, %p56_p2  ;;  %p182_p7 = scmp.lt.s32.totalorder %s1377_s23, 3 }
   0xf   : > { %s1379_s28 = smov [#allocation8]   ;;  %p1091_p10 = scmp.lt.s32.totalorder %s1377_s23, 2 }
  0x10   : > { %s1715_s26 = scalar_select %p1463_p6, 1, 0 }
  0x11   : > { %p1468_p8 = pnand %p927_p5, %p182_p7  ;;  %s197_s29 = sshll.u32 %s1379_s28, 4  ;;  %s198_s29 = int_to_ptr.vmem [resolvable:$true] %s197_s29 }
  0x12   : > { %p1481_p12 = pnand %p1091_p10, %p52_p4  ;;  %s31_s7 = sadd.s32 1, %s1373_s22 }
  0x13   : > { %s1716_s27 = scalar_select %p1468_p8, 1, 0 }
  0x14   : > { %p1079_p9 = pneg %p1468_p8  ;;  %s1719_s3 = sld [smem:[#allocation16_spill]] }
  0x15   : > { %s1718_s6 = scalar_select %p1481_p12, 1, 0 }
  0x16   : > { %p1477_p11 = pnand %p1079_p9, %p1706_p3 }
  0x18   : > { %p1203_p0 = pneg %p1477_p11 }
  0x1a   : > { %s1201_s10 = scalar_lea.hbm %s1719_s3, 1024 }
  0x1b   : > { %p1202_p13 = scmp.ne.s32.totalorder %s1719_s3, %s1201_s10  ;;  %p1208_p4 = scmp.lt.u32.totalorder %s1201_s10, %s1719_s3 }
  0x1d   : > { %p1204_p1 = pnand %p1203_p0, %p1202_p13 }
  0x1f   : > { %p1205_p2 = pneg %p1204_p1 }
  0x21   : > { %p1210_p5 = pnand %p1208_p4, %p1205_p2 }
  0x23   : > { %1213 = shalt.err (!%p1210_p5)
}
  0x24   : > { %s1214_s15 = scalar_lea.vmem %s198_s29, 1024  ;;  %p1222_p3 = scmp.lt.s32.totalorder %s198_s29, %s198_s29 }
  0x25   : > { %p1215_p7 = scmp.ne.s32.totalorder %s198_s29, %s1214_s15  ;;  %p1223_p6 = scmp.lt.s32.totalorder %s1214_s15, %s1214_s15 }
  0x27   : > { %p1217_p9 = pnand %p1215_p7, %p1203_p0  ;;  %p1224_p8 = por %p1223_p6, %p1222_p3 }
  0x29   : > { %p1218_p10 = pneg %p1217_p9 }
  0x2b   : > { %p1225_p12 = pnand %p1224_p8, %p1218_p10 }
  0x2d   : > { %1228 = shalt.err (!%p1225_p12)
}
  0x2e   : > { %s1710_s16 = smov 64   ;;  %s1711_s17 = smov 4  }
  0x2f   : > { %1082 = dma.hbm_to_vmem [thread:$0]  (!%p1477_p11), %s1719_s3, 1024, %s198_s29, [#allocation7], %s1710_s16, %s1710_s16, %s1711_s17  }
  0x30   : > { %p32_p3 = scmp.ge.s32.totalorder %s31_s7, 2  ;;  %s1506_s8 = sand.u32 1, %s1365_s20  }
  0x31   : > { %s992_s9 = sshll.u32 %s1373_s22, 8  ;;  %s930_s10 = sshll.u32 %s1506_s8, 5 }
  0x32   : > { %s1737_s7 = smov (%p32_p3, %s31_s7), 0  ;;  %s1721_s0 = sld [smem:[#allocation15_spill]] }
  0x33   : > { %1720 = sst [smem:[#allocation14_spill]] %s1737_s7  ;;  %s39_s30 = ssub.s32 %s1373_s22, %s1737_s7 }
  0x34   : > { %p41_p6 = scmp.eq.s32.totalorder %s39_s30, 0  ;;  %s218_s29 = scalar_lea.vmem [#allocation3], %s930_s10 }
  0x35   : > { %s228_s14 = sshll.u32 %s218_s29, 4  ;;  %s215_s28 = scalar_lea.sflag [#allocation4], %s1506_s8  ;;  %s1524_s14 = int_to_ptr.vmem [resolvable:$true] %s228_s14 }
  0x36   : > { %s1522_s15 = scalar_select %p41_p6, %s1365_s20, %s43_s25  }
  0x37   : > { %p1722_p11 = scmp.ne.s32.totalorder %s1718_s6, 0 }
  0x38   : > { %s1517_s13 = scalar_lea.hbm %s1721_s0, %s992_s9  ;;  %s1234_s10 = scalar_lea.hbm %s1721_s0, 1024 }
  0x39   : > { %s1229_s16 = scalar_lea.hbm %s1517_s13, 512  ;;  %p1231_p12 = pneg %p1722_p11 }
  0x3a   : > { %p1230_p8 = scmp.ne.s32.totalorder %s1517_s13, %s1229_s16  ;;  %p1235_p1 = scmp.lt.u32.totalorder %s1517_s13, %s1721_s0 }
  0x3b   : > { %p1236_p2 = scmp.lt.u32.totalorder %s1234_s10, %s1229_s16  ;;  %p1238_p5 = scmp.lt.u32.totalorder %s1229_s16, %s1517_s13 }
  0x3c   : > { %p1232_p13 = pnand %p1231_p12, %p1230_p8 }
  0x3d   : > { %p1237_p4 = por %p1236_p2, %p1235_p1 }
  0x3e   : > { %p1233_p0 = pneg %p1232_p13 }
  0x3f   : > { %p1239_p7 = por %p1238_p5, %p1237_p4 }
  0x41   : > { %p1240_p9 = pnand %p1239_p7, %p1233_p0 }
  0x43   : > { %1243 = shalt.err (!%p1240_p9)
}
  0x44   : > { %s1244_s25 = scalar_lea.vmem %s1524_s14, 512  ;;  %s1382_s29 = smov [#allocation3]  }
  0x45   : > { %p1245_p10 = scmp.ne.s32.totalorder %s1524_s14, %s1244_s25  ;;  %s1249_s9 = sshll.u32 %s1382_s29, 4  ;;  %s1250_s9 = int_to_ptr.vmem [resolvable:$false] %s1249_s9 }
  0x46   : > { %s1251_s30 = scalar_lea.vmem %s1250_s9, 1024  ;;  %p1252_p8 = scmp.lt.s32.totalorder %s1524_s14, %s1250_s9 }
  0x47   : > { %p1247_p3 = pnand %p1245_p10, %p1231_p12  ;;  %p1253_p13 = scmp.lt.s32.totalorder %s1251_s30, %s1244_s25 }
  0x49   : > { %p1248_p6 = pneg %p1247_p3  ;;  %p1254_p1 = por %p1253_p13, %p1252_p8 }
  0x4b   : > { %p1255_p2 = pnand %p1254_p1, %p1248_p6 }
  0x4d   : > { %1258 = shalt.err (!%p1255_p2)
}
  0x4e   : > { %s1383_s16 = smov 512   ;;  %s1384_s10 = smov 256  }
  0x4f   : > { %s1385_s11 = smov 16   ;;  %s933_s12 = sshll.u32 %s1506_s8, 8 }
  0x50   : > { %1086 = dma.hbm_to_vmem [thread:$0]  (!%p1722_p11), %s1517_s13, 512, %s1524_s14, %s215_s28, %s1383_s16, %s1384_s10, %s1385_s11  }
  0x51   : > { %s993_s29 = sshll.u32 %s1373_s22, 12  ;;  %s242_s17 = scalar_lea.vmem [#allocation6], %s933_s12 }
  0x52   : > { %s1560_s30 = scalar_lea.hbm %s1701_s1, %s993_s29  ;;  %s249_s18 = sshll.u32 %s242_s17, 4  ;;  %s1562_s18 = int_to_ptr.vmem [resolvable:$true] %s249_s18 }
  0x53   : > { %s1723_s0 = sand.u32 1, %s1377_s23   ;;  %s1259_s7 = scalar_lea.hbm %s1560_s30, 4096 }
  0x54   : > { %s1566_s3 = scalar_lea.sflag [#allocation7], %s1723_s0  ;;  %p1260_p0 = scmp.ne.s32.totalorder %s1560_s30, %s1259_s7 }
  0x55   : > { %s1264_s14 = scalar_lea.hbm %s1701_s1, 8192  ;;  %p1265_p7 = scmp.lt.u32.totalorder %s1560_s30, %s1701_s1 }
  0x56   : > { %p1262_p4 = pnand %p1260_p0, %p1231_p12  ;;  %p1266_p9 = scmp.lt.u32.totalorder %s1264_s14, %s1259_s7 }
  0x57   : > { %p1268_p3 = scmp.lt.u32.totalorder %s1259_s7, %s1560_s30 }
  0x58   : > { %p1263_p5 = pneg %p1262_p4  ;;  %p1267_p10 = por %p1266_p9, %p1265_p7 }
  0x5a   : > { %p1269_p6 = por %p1268_p3, %p1267_p10 }
  0x5c   : > { %p1270_p8 = pnand %p1269_p6, %p1263_p5 }
  0x5e   : > { %1273 = shalt.err (!%p1270_p8)
}
  0x5f   : > { %s1274_s0 = scalar_lea.vmem %s1562_s18, 4096  ;;  %s1386_s17 = smov [#allocation6]  }
  0x60   : > { %p1275_p13 = scmp.ne.s32.totalorder %s1562_s18, %s1274_s0  ;;  %s1279_s10 = sshll.u32 %s1386_s17, 4  ;;  %s1280_s10 = int_to_ptr.vmem [resolvable:$false] %s1279_s10 }
  0x61   : > { %s1281_s11 = scalar_lea.vmem %s1280_s10, 8192  ;;  %p1282_p0 = scmp.lt.s32.totalorder %s1562_s18, %s1280_s10 }
  0x62   : > { %p1277_p1 = pnand %p1275_p13, %p1231_p12  ;;  %p1283_p4 = scmp.lt.s32.totalorder %s1281_s11, %s1274_s0 }
  0x64   : > { %p1278_p2 = pneg %p1277_p1  ;;  %p1284_p7 = por %p1283_p4, %p1282_p0 }
  0x66   : > { %p1285_p9 = pnand %p1284_p7, %p1278_p2 }
  0x68   : > { %1288 = shalt.err (!%p1285_p9)
}
  0x69   : > { %s1724_s7 = smov 4   ;;  %s1725_s12 = smov 64  }
  0x6a   : > { %1089 = dma.hbm_to_vmem [thread:$0]  (!%p1722_p11), %s1560_s30, 4096, %s1562_s18, %s1566_s3, %s1725_s12, %s1725_s12, %s1724_s7  }
  0x6b   : > { %p1726_p12 = scmp.ne.s32.totalorder %s1716_s27, 0 }
  0x6c   : > { %s263_s29 = sand.u32 (!%p1726_p12), 1, %s1361_s19   ;;  %p1727_p5 = scmp.ne.s32.totalorder (!%p1726_p12), %s1715_s26, 0 }
  0x6d   : > { %261 = sbr.rel (%p1726_p12) target bundleno = 645 (0x285), region = 40  ;;  %s937_s25 = sshll.u32 (!%p1726_p12), %s263_s29, 5 }
  0x6e   : > { %s264_s9 = scalar_lea.sflag (!%p1726_p12), [#allocation4], %s263_s29  ;;  %s1598_s8 = scalar_lea.vmem (!%p1726_p12), [#allocation3], %s937_s25 }
  0x74   : > { %1340 = dma.done.wait (%p1727_p5), %s264_s9, 512  }
  0x75   : > { %1342 = vsyncadd (%p1727_p5), %s264_s9, 4294966784  ;;  %s272_s6 = sand.u32 1, %s1452_s24   ;;  %s938_s13 = sshll.u32 %s263_s29, 8 }
  0x76   : > { %s273_s3 = scalar_lea.sflag [#allocation7], %s272_s6  ;;  %s1605_s18 = scalar_lea.vmem [#allocation6], %s938_s13 }
  0x77   : > { %1344 = dma.done.wait (%p1727_p5), %s273_s3, 4096  }
  0x78   : > { %1346 = vsyncadd (%p1727_p5), %s273_s3, 4294963200  ;;  %p1728_p11 = scmp.eq.s32.totalorder %s1452_s24, 0 }
  0x7a   : > { %1348 = dma.done.wait (%p1728_p11), [#allocation7], 1024   ;;  %p1729_p10 = pmov %p1728_p11 }
  0x7b   : > { %p940_p3 = scmp.ne.s32.totalorder %s1369_s21, 0 }
  0x7c   : > { %1350 = vsyncadd (%p1729_p10), [#allocation7], 4294966272  ;;  %v1387_v0 = vmov (!%p940_p3), 0.0  }
  0x7d   : > { %315 = sbr.rel (%p940_p3) target bundleno = 132 (0x84), region = 56  ;;  %316 = vst [vmem:[#allocation2] sm:$0xff] (!%p940_p3), %v1387_v0  ;;  %317 = vst [vmem:[#allocation2 + $0x8] sm:$0xff] (!%p940_p3), %v1387_v0 }
  0x84 PF: > { %v1155_v1 = vld [vmem:[%s1605_s18 + $0x40] sm:$0xff]   ;;  %v1159_v5 = vld [vmem:[%s1605_s18 + $0x48] sm:$0xff]   ;;  %v1163_v9 = vld [vmem:[%s1605_s18 + $0x50] sm:$0xff]   ;;  %p977_p6 = scmp.ne.s32.totalorder %s1369_s21, 1 }
  0x85   : > { %v1156_v2 = vld [vmem:[%s1605_s18 + $0xc0] sm:$0xff]   ;;  %994 = vmatprep.subr.bf16.mxu0 %v1155_v1  ;;  %v1160_v6 = vld [vmem:[%s1605_s18 + $0xc8] sm:$0xff]   ;;  %v1164_v10 = vld [vmem:[%s1605_s18 + $0xd0] sm:$0xff]   ;;  %v1388_v56 = vmov (!%p977_p6), 0.0   ;;  %vm1389_vm0 = vmmov (!%p977_p6), 0  }
  0x86   : > { %v1157_v3 = vld [vmem:[%s1605_s18] sm:$0xff]   ;;  %1016 = vmatprep.subr.bf16.mxu1 %v1156_v2  ;;  %v1161_v7 = vld [vmem:[%s1605_s18 + $0x8] sm:$0xff]   ;;  %v1165_v11 = vld [vmem:[%s1605_s18 + $0x10] sm:$0xff]  }
  0x87   : > { %v1158_v4 = vld [vmem:[%s1605_s18 + $0x80] sm:$0xff]   ;;  %995 = vmatpush3.bf16.msra.mxu0 %v1157_v3  ;;  %v1162_v8 = vld [vmem:[%s1605_s18 + $0x88] sm:$0xff]   ;;  %v1166_v12 = vld [vmem:[%s1605_s18 + $0x90] sm:$0xff]  }
  0x88   : > { %1017 = vmatpush3.bf16.msra.mxu1 %v1158_v4  ;;  %996 = vmatprep.subr.bf16.mxu0 %v1159_v5  ;;  %v1167_v13 = vld [vmem:[%s1605_s18 + $0x58] sm:$0xff]   ;;  %v1171_v17 = vld [vmem:[%s1605_s18 + $0x60] sm:$0xff]   ;;  %v1175_v21 = vld [vmem:[%s1605_s18 + $0x68] sm:$0xff]  }
  0x89   : > { %1018 = vmatprep.subr.bf16.mxu1 %v1160_v6  ;;  %v1168_v14 = vld [vmem:[%s1605_s18 + $0xd8] sm:$0xff]   ;;  %v1172_v18 = vld [vmem:[%s1605_s18 + $0xe0] sm:$0xff]   ;;  %v1176_v22 = vld [vmem:[%s1605_s18 + $0xe8] sm:$0xff]  }
  0x8a   : > { %v1169_v15 = vld [vmem:[%s1605_s18 + $0x18] sm:$0xff]   ;;  %v1173_v19 = vld [vmem:[%s1605_s18 + $0x20] sm:$0xff]   ;;  %v1177_v23 = vld [vmem:[%s1605_s18 + $0x28] sm:$0xff]  }
  0x8b   : > { %997 = vmatpush3.bf16.msra.mxu0 %v1161_v7  ;;  %v1170_v16 = vld [vmem:[%s1605_s18 + $0x98] sm:$0xff]   ;;  %v1174_v20 = vld [vmem:[%s1605_s18 + $0xa0] sm:$0xff]   ;;  %v1178_v24 = vld [vmem:[%s1605_s18 + $0xa8] sm:$0xff]  }
  0x8c   : > { %1019 = vmatpush3.bf16.msra.mxu1 %v1162_v8  ;;  %998 = vmatprep.subr.bf16.mxu0 %v1163_v9  ;;  %v1179_v25 = vld [vmem:[%s1605_s18 + $0x70] sm:$0xff]   ;;  %v1183_v29 = vld [vmem:[%s1605_s18 + $0x78] sm:$0xff]   ;;  %v1193_v55 = vld [vmem:[#allocation8] sm:$0xff] (!%p977_p6)  }
  0x8d   : > { %1020 = vmatprep.subr.bf16.mxu1 %v1164_v10  ;;  %v1180_v26 = vld [vmem:[%s1605_s18 + $0xf0] sm:$0xff]   ;;  %v1184_v30 = vld [vmem:[%s1605_s18 + $0xf8] sm:$0xff]   ;;  %v1194_v57 = vld [vmem:[#allocation8 + $0x8] sm:$0xff] (!%p977_p6)  }
  0x8e   : > { %v1181_v27 = vld [vmem:[%s1605_s18 + $0x30] sm:$0xff]   ;;  %v1185_v31 = vld [vmem:[%s1605_s18 + $0x38] sm:$0xff]   ;;  %v1197_v60 = vld [vmem:[#allocation8 + $0x20] sm:$0xff] (!%p977_p6)  }
  0x8f   : > { %999 = vmatpush3.bf16.msra.mxu0 %v1165_v11  ;;  %v1182_v28 = vld [vmem:[%s1605_s18 + $0xb0] sm:$0xff]   ;;  %v1186_v32 = vld [vmem:[%s1605_s18 + $0xb8] sm:$0xff]   ;;  %v1198_v61 = vld [vmem:[#allocation8 + $0x28] sm:$0xff] (!%p977_p6)  }
  0x90   : > { %1021 = vmatpush3.bf16.msra.mxu1 %v1166_v12  ;;  %1000 = vmatprep.subr.bf16.mxu0 %v1167_v13  ;;  %v1187_v33 = vld [vmem:[%s1598_s8] ss:$16 sps:$4 sm:$0xff]   ;;  %v1189_v34 = vld [vmem:[%s1598_s8 + $0x4] ss:$16 sps:$4 sm:$0xff]   ;;  %v1190_v35 = vld [vmem:[%s1598_s8 + $0x8] ss:$16 sps:$4 sm:$0xff]  }
  0x91   : > { %1022 = vmatprep.subr.bf16.mxu1 %v1168_v14  ;;  %v1192_v36 = vld [vmem:[%s1598_s8 + $0xc] ss:$16 sps:$4 sm:$0xff]   ;;  %632 = vmatprep.mubr.bf16.mxu0 %v1189_v34  ;;  %v318_v46 = vld [vmem:[#allocation2] sm:$0xff] }
  0x92   : > { %673 = vmatprep.mubr.bf16.mxu1 %v1192_v36  ;;  %v319_v51 = vld [vmem:[#allocation2 + $0x8] sm:$0xff]  ;;  %v1195_v58 = vld [vmem:[#allocation8 + $0x10] sm:$0xff] (!%p977_p6)  }
  0x93   : > { %1001 = vmatpush3.bf16.msra.mxu0 %v1169_v15  ;;  %v1196_v59 = vld [vmem:[#allocation8 + $0x18] sm:$0xff] (!%p977_p6)   ;;  %v978_v0 = vld [vmem:[%s1702_s2] ss:$0 sm:$0xff] (!%p977_p6) }
  0x94   : > { %1023 = vmatpush3.bf16.msra.mxu1 %v1170_v16  ;;  %1002 = vmatprep.subr.bf16.mxu0 %v1171_v17  ;;  %v1199_v3 = vld [vmem:[#allocation8 + $0x30] sm:$0xff] (!%p977_p6)   ;;  %v1200_v6 = vld [vmem:[#allocation8 + $0x38] sm:$0xff] (!%p977_p6)  }
  0x95   : > { %1024 = vmatprep.subr.bf16.mxu1 %v1172_v18  ;;  %v979_v8 = vld [vmem:[%s1704_s4] ss:$0 sm:$0xff] (!%p977_p6) }
  0x97   : > { %1003 = vmatpush3.bf16.msra.mxu0 %v1173_v19 }
  0x98   : > { %1025 = vmatpush3.bf16.msra.mxu1 %v1174_v20  ;;  %1004 = vmatprep.subr.bf16.mxu0 %v1175_v21 }
  0x99   : > { %1026 = vmatprep.subr.bf16.mxu1 %v1176_v22 }
  0x9b   : > { %1005 = vmatpush3.bf16.msra.mxu0 %v1177_v23 }
  0x9c   : > { %1027 = vmatpush3.bf16.msra.mxu1 %v1178_v24  ;;  %1006 = vmatprep.subr.bf16.mxu0 %v1179_v25 }
  0x9d   : > { %1028 = vmatprep.subr.bf16.mxu1 %v1180_v26 }
  0x9f   : > { %1007 = vmatpush3.bf16.msra.mxu0 %v1181_v27 }
  0xa0   : > { %1029 = vmatpush3.bf16.msra.mxu1 %v1182_v28  ;;  %1008 = vmatprep.subr.bf16.mxu0 %v1183_v29 }
  0xa1   : > { %1030 = vmatprep.subr.bf16.mxu1 %v1184_v30 }
  0xa3   : > { %1009 = vmatpush3.bf16.msra.mxu0 %v1185_v31 }
  0xa4   : > { %1031 = vmatpush3.bf16.msra.mxu1 %v1186_v32  ;;  %1047 = vmatprep.subr.bf16.mxu0 (!%p977_p6), %v1388_v56 }
  0xa6   : > { %633 = vmatmul.mubr.bf16.vlgmr.msra.gmra.mrb[0].mxu0 %v1187_v33 }
  0xa7   : > { %674 = vmatmul.mubr.bf16.vlgmr.msra.gmra.mrb[0].mxu1 %v1190_v35  ;;  %1048 = vmatpush3.bf16.msra.mxu0 (!%p977_p6), %v1193_v55 }
  0xa8   : > { %1063 = vmatprep.mubr.msk.bf16.mxu0 (!%p977_p6), %vm1389_vm0, %v1388_v56  ;;  %1049 = vmatprep.subr.bf16.mxu0 (!%p977_p6), %v1388_v56 }
  0xab   : > { %1050 = vmatpush3.bf16.msra.mxu0 (!%p977_p6), %v1194_v57 }
  0xac   : > { %1051 = vmatprep.subr.bf16.mxu0 (!%p977_p6), %v1388_v56 }
  0xaf   : > { %1052 = vmatpush3.bf16.msra.mxu0 (!%p977_p6), %v1195_v58 }
  0xb0   : > { %1053 = vmatprep.subr.bf16.mxu0 (!%p977_p6), %v1388_v56 }
  0xb3   : > { %1054 = vmatpush3.bf16.msra.mxu0 (!%p977_p6), %v1196_v59 }
  0xb4   : > { %1055 = vmatprep.subr.bf16.mxu0 (!%p977_p6), %v1388_v56 }
  0xb7   : > { %1056 = vmatpush3.bf16.msra.mxu0 (!%p977_p6), %v1197_v60 }
  0xb8   : > { %1057 = vmatprep.subr.bf16.mxu0 (!%p977_p6), %v1388_v56 }
  0xbb   : > { %1058 = vmatpush3.bf16.msra.mxu0 (!%p977_p6), %v1198_v61 }
  0xbc   : > { %1059 = vmatprep.subr.bf16.mxu0 (!%p977_p6), %v1388_v56 }
  0xbf   : > { %1060 = vmatpush3.bf16.msra.mxu0 (!%p977_p6), %v1199_v3 }
  0xc0   : > { %1061 = vmatprep.subr.bf16.mxu0 (!%p977_p6), %v1388_v56 }
  0xc3   : > { %1062 = vmatpush3.bf16.msra.mxu0 (!%p977_p6), %v1200_v6 }
 0x179   : > { %v1010_v37 = vpop.f32.mrb[0].mxu0 }
 0x17a   : > { %v1032_v38 = vpop.f32.mrb[0].mxu1  ;;  %v1011_v39 = vpop.f32.mrb[1].mxu0 }
 0x17b   : > { %v1012_v40 = vadd.f32 %v1011_v39, %v1010_v37  ;;  %v1033_v41 = vpop.f32.mrb[1].mxu1  ;;  %v1013_v42 = vpop.f32.mrb[2].mxu0 }
 0x17c   : > { %v1034_v43 = vadd.f32 %v1033_v41, %v1032_v38  ;;  %v1035_v44 = vpop.f32.mrb[2].mxu1  ;;  %v1014_v45 = vpop.f32.mrb[3].mxu0 }
 0x17d   : > { %v1015_v47 = vadd.f32 %v1014_v45, %v1013_v42  ;;  %v1036_v48 = vpop.f32.mrb[3].mxu1 }
 0x17e   : > { %v676_v49 = vadd.f32 %v1034_v43, %v1012_v40  ;;  %v1037_v50 = vadd.f32 %v1036_v48, %v1035_v44  ;;  %689 = sbr.rel (%p977_p6) target bundleno = 619 (0x26b), region = 60 }
 0x180   : > { %v682_v52 = vadd.f32 %v676_v49, %v318_v46  ;;  %v679_v53 = vadd.f32 %v1037_v50, %v1015_v47 }
 0x182   : > { %684 = vst [vmem:[#allocation2] sm:$0xff] %v682_v52  ;;  %v683_v54 = vadd.f32 %v679_v53, %v319_v51 }
 0x184   : > { %685 = vst [vmem:[#allocation2 + $0x8] sm:$0xff] %v683_v54 }
 0x189   : > { %v690_v62 = vld [vmem:[#allocation2] sm:$0xff] }
 0x18a   : > { %v699_v1 = vadd.f32 %v978_v0, %v690_v62 }
 0x18b   : > { %v691_v63 = vld [vmem:[#allocation2 + $0x8] sm:$0xff] }
 0x18c   : > { %v700_v2 = vadd.f32 %v978_v0, %v691_v63  ;;  %v701_v4 = vmax.f32 %v699_v1, 0.0 }
 0x18e   : > { %v702_v5 = vmax.f32 %v700_v2, 0.0 }
 0x190   : > { %v703_v7 = vpack.c.bf16 %v702_v5, %v701_v4 }
 0x192   : > { %1064 = vmatmul.mubr.bf16.vlgmr.msra.gmra.mrb[0].mxu0 %v703_v7 }
 0x265   : > { %v809_v9 = vpop.f32.mrb[0].mxu0 }
 0x266   : > { %v810_v10 = vadd.f32 %v979_v8, %v809_v9  ;;  %v1065_v11 = vpop.f32.mrb[1].mxu0 }
 0x267   : > { %v812_v12 = vpop.f32.mrb[2].mxu0 }
 0x268   : > { %816 = vst [vmem:[#allocation9] sm:$0xff] %v810_v10  ;;  %v813_v13 = vadd.f32 %v979_v8, %v812_v12  ;;  %v1066_v14 = vpop.f32.mrb[3].mxu0 }
 0x26a   : > { %817 = vst [vmem:[#allocation9 + $0x8] sm:$0xff] %v813_v13 }
 0x26b PF: > { %p1093_p8 = scmp.eq.s32.totalorder %s1452_s24, 1  ;;  %s1390_s14 = smov [#allocation9]  }
 0x26c   : > { %s827_s28 = sshll.u32 %s1390_s14, 4  ;;  %s828_s28 = int_to_ptr.vmem [resolvable:$true] %s827_s28 }
 0x26d   : > { %s1289_s16 = scalar_lea.vmem %s828_s28, 256  ;;  %p1296_p0 = scmp.lt.s32.totalorder %s828_s28, %s828_s28 }
 0x26e   : > { %p1290_p13 = scmp.ne.s32.totalorder %s828_s28, %s1289_s16  ;;  %p1297_p4 = scmp.lt.s32.totalorder %s1289_s16, %s1289_s16 }
 0x270   : > { %p1291_p1 = pnand %p1290_p13, %p1093_p8  ;;  %p1298_p7 = por %p1297_p4, %p1296_p0 }
 0x272   : > { %p1292_p2 = pneg %p1291_p1 }
 0x274   : > { %p1299_p9 = pnand %p1298_p7, %p1292_p2 }
 0x276   : > { %1302 = shalt.err (!%p1299_p9)
}
 0x277   : > { %s1303_s10 = scalar_lea.hbm %s1705_s5, 256 }
 0x278   : > { %p1304_p12 = scmp.ne.s32.totalorder %s1705_s5, %s1303_s10  ;;  %p1309_p10 = scmp.lt.u32.totalorder %s1303_s10, %s1705_s5 }
 0x27a   : > { %p1305_p5 = pnand %p1304_p12, %p1093_p8 }
 0x27c   : > { %p1306_p11 = pneg %p1305_p5 }
 0x27e   : > { %p1311_p3 = pnand %p1309_p10, %p1306_p11 }
 0x280   : > { %1314 = shalt.err (!%p1311_p3)
}
 0x281   : > { %s1391_s25 = smov 128   ;;  %s1392_s9 = smov 8  }
 0x282   : > { %1076 = dma.vmem_to_hbm [thread:$0]  (%p1093_p8), %s828_s28, 256, %s1705_s5, [#allocation5], %s1391_s25, %s1391_s25, %s1392_s9  }
 0x283   : > { %1352 = dma.done.wait (%p1093_p8), [#allocation5], 256  }
 0x284   : > { %1354 = vsyncadd (%p1093_p8), [#allocation5], 4294967040 }
 0x285 PF: > { %s22_s23 = sadd.s32 1, %s1377_s23   ;;  %s1730_s13 = sld [smem:[#allocation14_spill]] }
 0x286   : > { %p19_p6 = scmp.ge.s32.totalorder %s22_s23, 4   ;;  %s1731_s18 = smov %s1361_s19 }
 0x287   : > { %s1732_s19 = smov %s1365_s20  ;;  %s1733_s20 = smov %s1522_s15 }
 0x288   : > { %s1734_s21 = smov %s1373_s22  ;;  %21 = sbr.rel (!%p19_p6) target bundleno = 10 (0xa), region = 103 }
 0x28b   : > { %s1735_s22 = smov %s1730_s13 }
 0x28f   :  { %843 = vsyncpa [#allocation4], 1 }
 0x290   :  { %845 = vsyncpa [#allocation4 + $0x1], 1 }
 0x291   :  { %846 = vsyncpa [#allocation7], 1 }
 0x292   :  { %848 = vsyncpa [#allocation7 + $0x1], 1 }
 0x293   :  { %849 = vsyncpa [#allocation5], 1 }
 0x294   :  { %851 = vsyncpa [#allocation5 + $0x1], 1 }

// kernel: tpu_custom_call.1
= control target key start
LH: loop header
LB: loop body
LE: loop exit
PB: predicated region body
PF: predicated region fallthrough
CT: control target
= control target key end

     0   :  { %s1700_s0 = inlined_call_operand.hbm [shape: bf16[16,1024], index: 0, kind: input, shape index: {}]   ;;  %s1701_s1 = inlined_call_operand.hbm [shape: bf16[1024,128], index: 1, kind: input, shape index: {}]   ;;  %s1702_s2 = inlined_call_operand.vmem [shape: f32[1,128], index: 2, kind: input, shape index: {}]   ;;  %s1703_s3 = inlined_call_operand.hbm [shape: bf16[128,128], index: 3, kind: input, shape index: {}]   ;;  %s1704_s4 = inlined_call_operand.vmem [shape: f32[1,128], index: 4, kind: input, shape index: {}]   ;;  %s1705_s5 = inlined_call_operand.hbm [shape: f32[16,128], index: 5, kind: output, shape index: {}]  }
   0x1   :  { %1713 = sst [smem:[#allocation15_spill]] %s1700_s0 }
   0x2   :  { %1714 = sst [smem:[#allocation16_spill]] %s1703_s3 }
   0x3   :  { %10 = vsyncpa [#allocation4], 0 }
   0x4   :  { %12 = vsyncpa [#allocation4 + $0x1], 0 }
   0x5   :  { %13 = vsyncpa [#allocation7], 0 }
   0x6   :  { %15 = vsyncpa [#allocation7 + $0x1], 0 }
   0x7   :  { %16 = vsyncpa [#allocation5], 0  ;;  %s1423_s18 = smov 0   ;;  %s1425_s19 = smov 0  }
   0x8   :  { %s1427_s20 = smov 0   ;;  %s1429_s21 = smov 0  }
   0x9   :  { %s1431_s22 = smov 0   ;;  %s1433_s23 = smov 0  }
   0xa LB: > { %s1452_s24 = sadd.s32 4294967295, %s1377_s23   ;;  %s43_s25 = sadd.s32 1, %s1365_s20  ;;  %s1377_s23 = sphi %s1433_s23, %s22_s23   ;;  %s1373_s22 = sphi %s1431_s22, %s1735_s22   ;;  %s1369_s21 = sphi %s1429_s21, %s1734_s21   ;;  %s1365_s20 = sphi %s1427_s20, %s1733_s20   ;;  %s1361_s19 = sphi %s1425_s19, %s1732_s19   ;;  %s1357_s18 = sphi %s1423_s18, %s1731_s18  }
   0xb   : > { %p50_p0 = scmp.ne.s32.totalorder %s1365_s20, %s1361_s19  ;;  %p51_p1 = scmp.eq.s32.totalorder %s1377_s23, 0 }
   0xc   : > { %p56_p2 = scmp.ne.s32.totalorder %s1361_s19, %s1357_s18  ;;  %p1706_p3 = scmp.eq.s32.totalorder %s1452_s24, 0 }
   0xd   : > { %p52_p4 = por %p51_p1, %p50_p0  ;;  %p927_p5 = scmp.ge.s32.totalorder %s1377_s23, 1 }
   0xe   : > { %p1463_p6 = por %p1706_p3, %p56_p2  ;;  %p182_p7 = scmp.lt.s32.totalorder %s1377_s23, 3 }
   0xf   : > { %s1379_s28 = smov [#allocation8]   ;;  %p1091_p10 = scmp.lt.s32.totalorder %s1377_s23, 2 }
  0x10   : > { %s1715_s26 = scalar_select %p1463_p6, 1, 0 }
  0x11   : > { %p1468_p8 = pnand %p927_p5, %p182_p7  ;;  %s197_s29 = sshll.u32 %s1379_s28, 4  ;;  %s198_s29 = int_to_ptr.vmem [resolvable:$true] %s197_s29 }
  0x12   : > { %p1481_p12 = pnand %p1091_p10, %p52_p4  ;;  %s31_s7 = sadd.s32 1, %s1373_s22 }
  0x13   : > { %s1716_s27 = scalar_select %p1468_p8, 1, 0 }
  0x14   : > { %p1079_p9 = pneg %p1468_p8  ;;  %s1719_s3 = sld [smem:[#allocation16_spill]] }
  0x15   : > { %s1718_s6 = scalar_select %p1481_p12, 1, 0 }
  0x16   : > { %p1477_p11 = pnand %p1079_p9, %p1706_p3 }
  0x18   : > { %p1203_p0 = pneg %p1477_p11 }
  0x1a   : > { %s1201_s10 = scalar_lea.hbm %s1719_s3, 1024 }
  0x1b   : > { %p1202_p13 = scmp.ne.s32.totalorder %s1719_s3, %s1201_s10  ;;  %p1208_p4 = scmp.lt.u32.totalorder %s1201_s10, %s1719_s3 }
  0x1d   : > { %p1204_p1 = pnand %p1203_p0, %p1202_p13 }
  0x1f   : > { %p1205_p2 = pneg %p1204_p1 }
  0x21   : > { %p1210_p5 = pnand %p1208_p4, %p1205_p2 }
  0x23   : > { %1213 = shalt.err (!%p1210_p5)
}
  0x24   : > { %s1214_s15 = scalar_lea.vmem %s198_s29, 1024  ;;  %p1222_p3 = scmp.lt.s32.totalorder %s198_s29, %s198_s29 }
  0x25   : > { %p1215_p7 = scmp.ne.s32.totalorder %s198_s29, %s1214_s15  ;;  %p1223_p6 = scmp.lt.s32.totalorder %s1214_s15, %s1214_s15 }
  0x27   : > { %p1217_p9 = pnand %p1215_p7, %p1203_p0  ;;  %p1224_p8 = por %p1223_p6, %p1222_p3 }
  0x29   : > { %p1218_p10 = pneg %p1217_p9 }
  0x2b   : > { %p1225_p12 = pnand %p1224_p8, %p1218_p10 }
  0x2d   : > { %1228 = shalt.err (!%p1225_p12)
}
  0x2e   : > { %s1710_s16 = smov 64   ;;  %s1711_s17 = smov 4  }
  0x2f   : > { %1082 = dma.hbm_to_vmem [thread:$0]  (!%p1477_p11), %s1719_s3, 1024, %s198_s29, [#allocation7], %s1710_s16, %s1710_s16, %s1711_s17  }
  0x30   : > { %p32_p3 = scmp.ge.s32.totalorder %s31_s7, 2  ;;  %s1506_s8 = sand.u32 1, %s1365_s20  }
  0x31   : > { %s992_s9 = sshll.u32 %s1373_s22, 8  ;;  %s930_s10 = sshll.u32 %s1506_s8, 5 }
  0x32   : > { %s1737_s7 = smov (%p32_p3, %s31_s7), 0  ;;  %s1721_s0 = sld [smem:[#allocation15_spill]] }
  0x33   : > { %1720 = sst [smem:[#allocation14_spill]] %s1737_s7  ;;  %s39_s30 = ssub.s32 %s1373_s22, %s1737_s7 }
  0x34   : > { %p41_p6 = scmp.eq.s32.totalorder %s39_s30, 0  ;;  %s218_s29 = scalar_lea.vmem [#allocation3], %s930_s10 }
  0x35   : > { %s228_s14 = sshll.u32 %s218_s29, 4  ;;  %s215_s28 = scalar_lea.sflag [#allocation4], %s1506_s8  ;;  %s1524_s14 = int_to_ptr.vmem [resolvable:$true] %s228_s14 }
  0x36   : > { %s1522_s15 = scalar_select %p41_p6, %s1365_s20, %s43_s25  }
  0x37   : > { %p1722_p11 = scmp.ne.s32.totalorder %s1718_s6, 0 }
  0x38   : > { %s1517_s13 = scalar_lea.hbm %s1721_s0, %s992_s9  ;;  %s1234_s10 = scalar_lea.hbm %s1721_s0, 1024 }
  0x39   : > { %s1229_s16 = scalar_lea.hbm %s1517_s13, 512  ;;  %p1231_p12 = pneg %p1722_p11 }
  0x3a   : > { %p1230_p8 = scmp.ne.s32.totalorder %s1517_s13, %s1229_s16  ;;  %p1235_p1 = scmp.lt.u32.totalorder %s1517_s13, %s1721_s0 }
  0x3b   : > { %p1236_p2 = scmp.lt.u32.totalorder %s1234_s10, %s1229_s16  ;;  %p1238_p5 = scmp.lt.u32.totalorder %s1229_s16, %s1517_s13 }
  0x3c   : > { %p1232_p13 = pnand %p1231_p12, %p1230_p8 }
  0x3d   : > { %p1237_p4 = por %p1236_p2, %p1235_p1 }
  0x3e   : > { %p1233_p0 = pneg %p1232_p13 }
  0x3f   : > { %p1239_p7 = por %p1238_p5, %p1237_p4 }
  0x41   : > { %p1240_p9 = pnand %p1239_p7, %p1233_p0 }
  0x43   : > { %1243 = shalt.err (!%p1240_p9)
}
  0x44   : > { %s1244_s25 = scalar_lea.vmem %s1524_s14, 512  ;;  %s1382_s29 = smov [#allocation3]  }
  0x45   : > { %p1245_p10 = scmp.ne.s32.totalorder %s1524_s14, %s1244_s25  ;;  %s1249_s9 = sshll.u32 %s1382_s29, 4  ;;  %s1250_s9 = int_to_ptr.vmem [resolvable:$false] %s1249_s9 }
  0x46   : > { %s1251_s30 = scalar_lea.vmem %s1250_s9, 1024  ;;  %p1252_p8 = scmp.lt.s32.totalorder %s1524_s14, %s1250_s9 }
  0x47   : > { %p1247_p3 = pnand %p1245_p10, %p1231_p12  ;;  %p1253_p13 = scmp.lt.s32.totalorder %s1251_s30, %s1244_s25 }
  0x49   : > { %p1248_p6 = pneg %p1247_p3  ;;  %p1254_p1 = por %p1253_p13, %p1252_p8 }
  0x4b   : > { %p1255_p2 = pnand %p1254_p1, %p1248_p6 }
  0x4d   : > { %1258 = shalt.err (!%p1255_p2)
}
  0x4e   : > { %s1383_s16 = smov 512   ;;  %s1384_s10 = smov 256  }
  0x4f   : > { %s1385_s11 = smov 16   ;;  %s933_s12 = sshll.u32 %s1506_s8, 8 }
  0x50   : > { %1086 = dma.hbm_to_vmem [thread:$0]  (!%p1722_p11), %s1517_s13, 512, %s1524_s14, %s215_s28, %s1383_s16, %s1384_s10, %s1385_s11  }
  0x51   : > { %s993_s29 = sshll.u32 %s1373_s22, 12  ;;  %s242_s17 = scalar_lea.vmem [#allocation6], %s933_s12 }
  0x52   : > { %s1560_s30 = scalar_lea.hbm %s1701_s1, %s993_s29  ;;  %s249_s18 = sshll.u32 %s242_s17, 4  ;;  %s1562_s18 = int_to_ptr.vmem [resolvable:$true] %s249_s18 }
  0x53   : > { %s1723_s0 = sand.u32 1, %s1377_s23   ;;  %s1259_s7 = scalar_lea.hbm %s1560_s30, 4096 }
  0x54   : > { %s1566_s3 = scalar_lea.sflag [#allocation7], %s1723_s0  ;;  %p1260_p0 = scmp.ne.s32.totalorder %s1560_s30, %s1259_s7 }
  0x55   : > { %s1264_s14 = scalar_lea.hbm %s1701_s1, 8192  ;;  %p1265_p7 = scmp.lt.u32.totalorder %s1560_s30, %s1701_s1 }
  0x56   : > { %p1262_p4 = pnand %p1260_p0, %p1231_p12  ;;  %p1266_p9 = scmp.lt.u32.totalorder %s1264_s14, %s1259_s7 }
  0x57   : > { %p1268_p3 = scmp.lt.u32.totalorder %s1259_s7, %s1560_s30 }
  0x58   : > { %p1263_p5 = pneg %p1262_p4  ;;  %p1267_p10 = por %p1266_p9, %p1265_p7 }
  0x5a   : > { %p1269_p6 = por %p1268_p3, %p1267_p10 }
  0x5c   : > { %p1270_p8 = pnand %p1269_p6, %p1263_p5 }
  0x5e   : > { %1273 = shalt.err (!%p1270_p8)
}
  0x5f   : > { %s1274_s0 = scalar_lea.vmem %s1562_s18, 4096  ;;  %s1386_s17 = smov [#allocation6]  }
  0x60   : > { %p1275_p13 = scmp.ne.s32.totalorder %s1562_s18, %s1274_s0  ;;  %s1279_s10 = sshll.u32 %s1386_s17, 4  ;;  %s1280_s10 = int_to_ptr.vmem [resolvable:$false] %s1279_s10 }
  0x61   : > { %s1281_s11 = scalar_lea.vmem %s1280_s10, 8192  ;;  %p1282_p0 = scmp.lt.s32.totalorder %s1562_s18, %s1280_s10 }
  0x62   : > { %p1277_p1 = pnand %p1275_p13, %p1231_p12  ;;  %p1283_p4 = scmp.lt.s32.totalorder %s1281_s11, %s1274_s0 }
  0x64   : > { %p1278_p2 = pneg %p1277_p1  ;;  %p1284_p7 = por %p1283_p4, %p1282_p0 }
  0x66   : > { %p1285_p9 = pnand %p1284_p7, %p1278_p2 }
  0x68   : > { %1288 = shalt.err (!%p1285_p9)
}
  0x69   : > { %s1724_s7 = smov 4   ;;  %s1725_s12 = smov 64  }
  0x6a   : > { %1089 = dma.hbm_to_vmem [thread:$0]  (!%p1722_p11), %s1560_s30, 4096, %s1562_s18, %s1566_s3, %s1725_s12, %s1725_s12, %s1724_s7  }
  0x6b   : > { %p1726_p12 = scmp.ne.s32.totalorder %s1716_s27, 0 }
  0x6c   : > { %s263_s29 = sand.u32 (!%p1726_p12), 1, %s1361_s19   ;;  %p1727_p5 = scmp.ne.s32.totalorder (!%p1726_p12), %s1715_s26, 0 }
  0x6d   : > { %261 = sbr.rel (%p1726_p12) target bundleno = 645 (0x285), region = 40  ;;  %s937_s25 = sshll.u32 (!%p1726_p12), %s263_s29, 5 }
  0x6e   : > { %s264_s9 = scalar_lea.sflag (!%p1726_p12), [#allocation4], %s263_s29  ;;  %s1598_s8 = scalar_lea.vmem (!%p1726_p12), [#allocation3], %s937_s25 }
  0x74   : > { %1340 = dma.done.wait (%p1727_p5), %s264_s9, 512  }
  0x75   : > { %1342 = vsyncadd (%p1727_p5), %s264_s9, 4294966784  ;;  %s272_s6 = sand.u32 1, %s1452_s24   ;;  %s938_s13 = sshll.u32 %s263_s29, 8 }
  0x76   : > { %s273_s3 = scalar_lea.sflag [#allocation7], %s272_s6  ;;  %s1605_s18 = scalar_lea.vmem [#allocation6], %s938_s13 }
  0x77   : > { %1344 = dma.done.wait (%p1727_p5), %s273_s3, 4096  }
  0x78   : > { %1346 = vsyncadd (%p1727_p5), %s273_s3, 4294963200  ;;  %p1728_p11 = scmp.eq.s32.totalorder %s1452_s24, 0 }
  0x7a   : > { %1348 = dma.done.wait (%p1728_p11), [#allocation7], 1024   ;;  %p1729_p10 = pmov %p1728_p11 }
  0x7b   : > { %p940_p3 = scmp.ne.s32.totalorder %s1369_s21, 0 }
  0x7c   : > { %1350 = vsyncadd (%p1729_p10), [#allocation7], 4294966272  ;;  %v1387_v0 = vmov (!%p940_p3), 0.0  }
  0x7d   : > { %315 = sbr.rel (%p940_p3) target bundleno = 132 (0x84), region = 56  ;;  %316 = vst [vmem:[#allocation2] sm:$0xff] (!%p940_p3), %v1387_v0  ;;  %317 = vst [vmem:[#allocation2 + $0x8] sm:$0xff] (!%p940_p3), %v1387_v0 }
  0x84 PF: > { %v1155_v1 = vld [vmem:[%s1605_s18 + $0x40] sm:$0xff]   ;;  %v1159_v5 = vld [vmem:[%s1605_s18 + $0x48] sm:$0xff]   ;;  %v1163_v9 = vld [vmem:[%s1605_s18 + $0x50] sm:$0xff]   ;;  %p977_p6 = scmp.ne.s32.totalorder %s1369_s21, 1 }
  0x85   : > { %v1156_v2 = vld [vmem:[%s1605_s18 + $0xc0] sm:$0xff]   ;;  %994 = vmatprep.subr.bf16.mxu0 %v1155_v1  ;;  %v1160_v6 = vld [vmem:[%s1605_s18 + $0xc8] sm:$0xff]   ;;  %v1164_v10 = vld [vmem:[%s1605_s18 + $0xd0] sm:$0xff]   ;;  %v1388_v56 = vmov (!%p977_p6), 0.0   ;;  %vm1389_vm0 = vmmov (!%p977_p6), 0  }
  0x86   : > { %v1157_v3 = vld [vmem:[%s1605_s18] sm:$0xff]   ;;  %1016 = vmatprep.subr.bf16.mxu1 %v1156_v2  ;;  %v1161_v7 = vld [vmem:[%s1605_s18 + $0x8] sm:$0xff]   ;;  %v1165_v11 = vld [vmem:[%s1605_s18 + $0x10] sm:$0xff]  }
  0x87   : > { %v1158_v4 = vld [vmem:[%s1605_s18 + $0x80] sm:$0xff]   ;;  %995 = vmatpush3.bf16.msra.mxu0 %v1157_v3  ;;  %v1162_v8 = vld [vmem:[%s1605_s18 + $0x88] sm:$0xff]   ;;  %v1166_v12 = vld [vmem:[%s1605_s18 + $0x90] sm:$0xff]  }
  0x88   : > { %1017 = vmatpush3.bf16.msra.mxu1 %v1158_v4  ;;  %996 = vmatprep.subr.bf16.mxu0 %v1159_v5  ;;  %v1167_v13 = vld [vmem:[%s1605_s18 + $0x58] sm:$0xff]   ;;  %v1171_v17 = vld [vmem:[%s1605_s18 + $0x60] sm:$0xff]   ;;  %v1175_v21 = vld [vmem:[%s1605_s18 + $0x68] sm:$0xff]  }
  0x89   : > { %1018 = vmatprep.subr.bf16.mxu1 %v1160_v6  ;;  %v1168_v14 = vld [vmem:[%s1605_s18 + $0xd8] sm:$0xff]   ;;  %v1172_v18 = vld [vmem:[%s1605_s18 + $0xe0] sm:$0xff]   ;;  %v1176_v22 = vld [vmem:[%s1605_s18 + $0xe8] sm:$0xff]  }
  0x8a   : > { %v1169_v15 = vld [vmem:[%s1605_s18 + $0x18] sm:$0xff]   ;;  %v1173_v19 = vld [vmem:[%s1605_s18 + $0x20] sm:$0xff]   ;;  %v1177_v23 = vld [vmem:[%s1605_s18 + $0x28] sm:$0xff]  }
  0x8b   : > { %997 = vmatpush3.bf16.msra.mxu0 %v1161_v7  ;;  %v1170_v16 = vld [vmem:[%s1605_s18 + $0x98] sm:$0xff]   ;;  %v1174_v20 = vld [vmem:[%s1605_s18 + $0xa0] sm:$0xff]   ;;  %v1178_v24 = vld [vmem:[%s1605_s18 + $0xa8] sm:$0xff]  }
  0x8c   : > { %1019 = vmatpush3.bf16.msra.mxu1 %v1162_v8  ;;  %998 = vmatprep.subr.bf16.mxu0 %v1163_v9  ;;  %v1179_v25 = vld [vmem:[%s1605_s18 + $0x70] sm:$0xff]   ;;  %v1183_v29 = vld [vmem:[%s1605_s18 + $0x78] sm:$0xff]   ;;  %v1193_v55 = vld [vmem:[#allocation8] sm:$0xff] (!%p977_p6)  }
  0x8d   : > { %1020 = vmatprep.subr.bf16.mxu1 %v1164_v10  ;;  %v1180_v26 = vld [vmem:[%s1605_s18 + $0xf0] sm:$0xff]   ;;  %v1184_v30 = vld [vmem:[%s1605_s18 + $0xf8] sm:$0xff]   ;;  %v1194_v57 = vld [vmem:[#allocation8 + $0x8] sm:$0xff] (!%p977_p6)  }
  0x8e   : > { %v1181_v27 = vld [vmem:[%s1605_s18 + $0x30] sm:$0xff]   ;;  %v1185_v31 = vld [vmem:[%s1605_s18 + $0x38] sm:$0xff]   ;;  %v1197_v60 = vld [vmem:[#allocation8 + $0x20] sm:$0xff] (!%p977_p6)  }
  0x8f   : > { %999 = vmatpush3.bf16.msra.mxu0 %v1165_v11  ;;  %v1182_v28 = vld [vmem:[%s1605_s18 + $0xb0] sm:$0xff]   ;;  %v1186_v32 = vld [vmem:[%s1605_s18 + $0xb8] sm:$0xff]   ;;  %v1198_v61 = vld [vmem:[#allocation8 + $0x28] sm:$0xff] (!%p977_p6)  }
  0x90   : > { %1021 = vmatpush3.bf16.msra.mxu1 %v1166_v12  ;;  %1000 = vmatprep.subr.bf16.mxu0 %v1167_v13  ;;  %v1187_v33 = vld [vmem:[%s1598_s8] ss:$16 sps:$4 sm:$0xff]   ;;  %v1189_v34 = vld [vmem:[%s1598_s8 + $0x4] ss:$16 sps:$4 sm:$0xff]   ;;  %v1190_v35 = vld [vmem:[%s1598_s8 + $0x8] ss:$16 sps:$4 sm:$0xff]  }
  0x91   : > { %1022 = vmatprep.subr.bf16.mxu1 %v1168_v14  ;;  %v1192_v36 = vld [vmem:[%s1598_s8 + $0xc] ss:$16 sps:$4 sm:$0xff]   ;;  %632 = vmatprep.mubr.bf16.mxu0 %v1189_v34  ;;  %v318_v46 = vld [vmem:[#allocation2] sm:$0xff] }
  0x92   : > { %673 = vmatprep.mubr.bf16.mxu1 %v1192_v36  ;;  %v319_v51 = vld [vmem:[#allocation2 + $0x8] sm:$0xff]  ;;  %v1195_v58 = vld [vmem:[#allocation8 + $0x10] sm:$0xff] (!%p977_p6)  }
  0x93   : > { %1001 = vmatpush3.bf16.msra.mxu0 %v1169_v15  ;;  %v1196_v59 = vld [vmem:[#allocation8 + $0x18] sm:$0xff] (!%p977_p6)   ;;  %v978_v0 = vld [vmem:[%s1702_s2] ss:$0 sm:$0xff] (!%p977_p6) }
  0x94   : > { %1023 = vmatpush3.bf16.msra.mxu1 %v1170_v16  ;;  %1002 = vmatprep.subr.bf16.mxu0 %v1171_v17  ;;  %v1199_v3 = vld [vmem:[#allocation8 + $0x30] sm:$0xff] (!%p977_p6)   ;;  %v1200_v6 = vld [vmem:[#allocation8 + $0x38] sm:$0xff] (!%p977_p6)  }
  0x95   : > { %1024 = vmatprep.subr.bf16.mxu1 %v1172_v18  ;;  %v979_v8 = vld [vmem:[%s1704_s4] ss:$0 sm:$0xff] (!%p977_p6) }
  0x97   : > { %1003 = vmatpush3.bf16.msra.mxu0 %v1173_v19 }
  0x98   : > { %1025 = vmatpush3.bf16.msra.mxu1 %v1174_v20  ;;  %1004 = vmatprep.subr.bf16.mxu0 %v1175_v21 }
  0x99   : > { %1026 = vmatprep.subr.bf16.mxu1 %v1176_v22 }
  0x9b   : > { %1005 = vmatpush3.bf16.msra.mxu0 %v1177_v23 }
  0x9c   : > { %1027 = vmatpush3.bf16.msra.mxu1 %v1178_v24  ;;  %1006 = vmatprep.subr.bf16.mxu0 %v1179_v25 }
  0x9d   : > { %1028 = vmatprep.subr.bf16.mxu1 %v1180_v26 }
  0x9f   : > { %1007 = vmatpush3.bf16.msra.mxu0 %v1181_v27 }
  0xa0   : > { %1029 = vmatpush3.bf16.msra.mxu1 %v1182_v28  ;;  %1008 = vmatprep.subr.bf16.mxu0 %v1183_v29 }
  0xa1   : > { %1030 = vmatprep.subr.bf16.mxu1 %v1184_v30 }
  0xa3   : > { %1009 = vmatpush3.bf16.msra.mxu0 %v1185_v31 }
  0xa4   : > { %1031 = vmatpush3.bf16.msra.mxu1 %v1186_v32  ;;  %1047 = vmatprep.subr.bf16.mxu0 (!%p977_p6), %v1388_v56 }
  0xa6   : > { %633 = vmatmul.mubr.bf16.vlgmr.msra.gmra.mrb[0].mxu0 %v1187_v33 }
  0xa7   : > { %674 = vmatmul.mubr.bf16.vlgmr.msra.gmra.mrb[0].mxu1 %v1190_v35  ;;  %1048 = vmatpush3.bf16.msra.mxu0 (!%p977_p6), %v1193_v55 }
  0xa8   : > { %1063 = vmatprep.mubr.msk.bf16.mxu0 (!%p977_p6), %vm1389_vm0, %v1388_v56  ;;  %1049 = vmatprep.subr.bf16.mxu0 (!%p977_p6), %v1388_v56 }
  0xab   : > { %1050 = vmatpush3.bf16.msra.mxu0 (!%p977_p6), %v1194_v57 }
  0xac   : > { %1051 = vmatprep.subr.bf16.mxu0 (!%p977_p6), %v1388_v56 }
  0xaf   : > { %1052 = vmatpush3.bf16.msra.mxu0 (!%p977_p6), %v1195_v58 }
  0xb0   : > { %1053 = vmatprep.subr.bf16.mxu0 (!%p977_p6), %v1388_v56 }
  0xb3   : > { %1054 = vmatpush3.bf16.msra.mxu0 (!%p977_p6), %v1196_v59 }
  0xb4   : > { %1055 = vmatprep.subr.bf16.mxu0 (!%p977_p6), %v1388_v56 }
  0xb7   : > { %1056 = vmatpush3.bf16.msra.mxu0 (!%p977_p6), %v1197_v60 }
  0xb8   : > { %1057 = vmatprep.subr.bf16.mxu0 (!%p977_p6), %v1388_v56 }
  0xbb   : > { %1058 = vmatpush3.bf16.msra.mxu0 (!%p977_p6), %v1198_v61 }
  0xbc   : > { %1059 = vmatprep.subr.bf16.mxu0 (!%p977_p6), %v1388_v56 }
  0xbf   : > { %1060 = vmatpush3.bf16.msra.mxu0 (!%p977_p6), %v1199_v3 }
  0xc0   : > { %1061 = vmatprep.subr.bf16.mxu0 (!%p977_p6), %v1388_v56 }
  0xc3   : > { %1062 = vmatpush3.bf16.msra.mxu0 (!%p977_p6), %v1200_v6 }
 0x179   : > { %v1010_v37 = vpop.f32.mrb[0].mxu0 }
 0x17a   : > { %v1032_v38 = vpop.f32.mrb[0].mxu1  ;;  %v1011_v39 = vpop.f32.mrb[1].mxu0 }
 0x17b   : > { %v1012_v40 = vadd.f32 %v1011_v39, %v1010_v37  ;;  %v1033_v41 = vpop.f32.mrb[1].mxu1  ;;  %v1013_v42 = vpop.f32.mrb[2].mxu0 }
 0x17c   : > { %v1034_v43 = vadd.f32 %v1033_v41, %v1032_v38  ;;  %v1035_v44 = vpop.f32.mrb[2].mxu1  ;;  %v1014_v45 = vpop.f32.mrb[3].mxu0 }
 0x17d   : > { %v1015_v47 = vadd.f32 %v1014_v45, %v1013_v42  ;;  %v1036_v48 = vpop.f32.mrb[3].mxu1 }
 0x17e   : > { %v676_v49 = vadd.f32 %v1034_v43, %v1012_v40  ;;  %v1037_v50 = vadd.f32 %v1036_v48, %v1035_v44  ;;  %689 = sbr.rel (%p977_p6) target bundleno = 619 (0x26b), region = 60 }
 0x180   : > { %v682_v52 = vadd.f32 %v676_v49, %v318_v46  ;;  %v679_v53 = vadd.f32 %v1037_v50, %v1015_v47 }
 0x182   : > { %684 = vst [vmem:[#allocation2] sm:$0xff] %v682_v52  ;;  %v683_v54 = vadd.f32 %v679_v53, %v319_v51 }
 0x184   : > { %685 = vst [vmem:[#allocation2 + $0x8] sm:$0xff] %v683_v54 }
 0x189   : > { %v690_v62 = vld [vmem:[#allocation2] sm:$0xff] }
 0x18a   : > { %v699_v1 = vadd.f32 %v978_v0, %v690_v62 }
 0x18b   : > { %v691_v63 = vld [vmem:[#allocation2 + $0x8] sm:$0xff] }
 0x18c   : > { %v700_v2 = vadd.f32 %v978_v0, %v691_v63  ;;  %v701_v4 = vmax.f32 %v699_v1, 0.0 }
 0x18e   : > { %v702_v5 = vmax.f32 %v700_v2, 0.0 }
 0x190   : > { %v703_v7 = vpack.c.bf16 %v702_v5, %v701_v4 }
 0x192   : > { %1064 = vmatmul.mubr.bf16.vlgmr.msra.gmra.mrb[0].mxu0 %v703_v7 }
 0x265   : > { %v809_v9 = vpop.f32.mrb[0].mxu0 }
 0x266   : > { %v810_v10 = vadd.f32 %v979_v8, %v809_v9  ;;  %v1065_v11 = vpop.f32.mrb[1].mxu0 }
 0x267   : > { %v812_v12 = vpop.f32.mrb[2].mxu0 }
 0x268   : > { %816 = vst [vmem:[#allocation9] sm:$0xff] %v810_v10  ;;  %v813_v13 = vadd.f32 %v979_v8, %v812_v12  ;;  %v1066_v14 = vpop.f32.mrb[3].mxu0 }
 0x26a   : > { %817 = vst [vmem:[#allocation9 + $0x8] sm:$0xff] %v813_v13 }
 0x26b PF: > { %p1093_p8 = scmp.eq.s32.totalorder %s1452_s24, 1  ;;  %s1390_s14 = smov [#allocation9]  }
 0x26c   : > { %s827_s28 = sshll.u32 %s1390_s14, 4  ;;  %s828_s28 = int_to_ptr.vmem [resolvable:$true] %s827_s28 }
 0x26d   : > { %s1289_s16 = scalar_lea.vmem %s828_s28, 256  ;;  %p1296_p0 = scmp.lt.s32.totalorder %s828_s28, %s828_s28 }
 0x26e   : > { %p1290_p13 = scmp.ne.s32.totalorder %s828_s28, %s1289_s16  ;;  %p1297_p4 = scmp.lt.s32.totalorder %s1289_s16, %s1289_s16 }
 0x270   : > { %p1291_p1 = pnand %p1290_p13, %p1093_p8  ;;  %p1298_p7 = por %p1297_p4, %p1296_p0 }
 0x272   : > { %p1292_p2 = pneg %p1291_p1 }
 0x274   : > { %p1299_p9 = pnand %p1298_p7, %p1292_p2 }
 0x276   : > { %1302 = shalt.err (!%p1299_p9)
}
 0x277   : > { %s1303_s10 = scalar_lea.hbm %s1705_s5, 256 }
 0x278   : > { %p1304_p12 = scmp.ne.s32.totalorder %s1705_s5, %s1303_s10  ;;  %p1309_p10 = scmp.lt.u32.totalorder %s1303_s10, %s1705_s5 }
 0x27a   : > { %p1305_p5 = pnand %p1304_p12, %p1093_p8 }
 0x27c   : > { %p1306_p11 = pneg %p1305_p5 }
 0x27e   : > { %p1311_p3 = pnand %p1309_p10, %p1306_p11 }
 0x280   : > { %1314 = shalt.err (!%p1311_p3)
}
 0x281   : > { %s1391_s25 = smov 128   ;;  %s1392_s9 = smov 8  }
 0x282   : > { %1076 = dma.vmem_to_hbm [thread:$0]  (%p1093_p8), %s828_s28, 256, %s1705_s5, [#allocation5], %s1391_s25, %s1391_s25, %s1392_s9  }
 0x283   : > { %1352 = dma.done.wait (%p1093_p8), [#allocation5], 256  }
 0x284   : > { %1354 = vsyncadd (%p1093_p8), [#allocation5], 4294967040 }
 0x285 PF: > { %s22_s23 = sadd.s32 1, %s1377_s23   ;;  %s1730_s13 = sld [smem:[#allocation14_spill]] }
 0x286   : > { %p19_p6 = scmp.ge.s32.totalorder %s22_s23, 4   ;;  %s1731_s18 = smov %s1361_s19 }
 0x287   : > { %s1732_s19 = smov %s1365_s20  ;;  %s1733_s20 = smov %s1522_s15 }
 0x288   : > { %s1734_s21 = smov %s1373_s22  ;;  %21 = sbr.rel (!%p19_p6) target bundleno = 10 (0xa), region = 103 }
 0x28b   : > { %s1735_s22 = smov %s1730_s13 }
 0x28f   :  { %843 = vsyncpa [#allocation4], 1 }
 0x290   :  { %845 = vsyncpa [#allocation4 + $0x1], 1 }
 0x291   :  { %846 = vsyncpa [#allocation7], 1 }
 0x292   :  { %848 = vsyncpa [#allocation7 + $0x1], 1 }
 0x293   :  { %849 = vsyncpa [#allocation5], 1 }
 0x294   :  { %851 = vsyncpa [#allocation5 + $0x1], 1 }

</bundles_post_ra>
